<compile_context>
chip_gen: v7x
topology: tpu7x:2x2x1
jax: 0.10.0
libtpu: 0.0.40
codegen_flags: <defaults>
</compile_context>

<pallas_src>
import jax
import jax.numpy as jnp
from jax import lax
from jax.experimental import pallas as pl
from jax.experimental.pallas import tpu as pltpu


def mlp_kernel(x_ref, w1_ref, b1_ref, w2_ref, b2_ref, wo_ref, bo_ref, o_ref):
    """x_ref is a (tile_b, d_in) f32 tile in native layout; activations are kept
    as (features, tile_b) so the batch sits on the lane axis throughout."""
    x = x_ref[...].astype(w1_ref.dtype)                        # f32 -> bf16 on the VPU

    # fc1 -> ReLU   (dropout = identity in eval).  Contract the feature axis of
    # both operands: (h1, d_in) x (tile_b, d_in) -> (h1, tile_b), batch on lanes.
    h = lax.dot_general(w1_ref[...], x, (((1,), (1,)), ((), ())),
                        preferred_element_type=jnp.float32)
    h = jnp.maximum(h + b1_ref[...], 0.0)                      # (h1, tile_b) f32

    # fc2 -> ReLU
    h = jnp.dot(w2_ref[...], h.astype(w2_ref.dtype),
                preferred_element_type=jnp.float32)
    h = jnp.maximum(h + b2_ref[...], 0.0)                      # (h2, tile_b) f32

    # Output layer: 1-row matmul replaced by VPU multiply + XLU sublane reduction
    # (full f32; frees the MXU and drops one f32->bf16 cast of h).
    z = jnp.sum(wo_ref[...] * h, axis=0, keepdims=True) + bo_ref[...]
    o_ref[...] = jax.nn.sigmoid(z)                             # (1, tile_b) f32, lane-dense


def mlp_forward(x, params, *, tile_b=None, mxu_dtype=jnp.bfloat16):
    """x: (B, d_in) f32 in native layout.  params: torch-layout (W(out,in), b(out,)).
    Returns (B, 1) float32 probabilities (eval-mode forward)."""
    w1, b1, w2, b2, wo, bo = params
    B, d_in = x.shape
    h1, h2 = w1.shape[0], w2.shape[0]
    assert w1.shape == (h1, d_in) and w2.shape == (h2, h1) and wo.shape == (1, h2)

    if tile_b is None:
        # Size for grid length, not VMEM.  Small batches: one grid step (block shape
        # equals the full batch, so no raggedness).  Large batches: tile_b = 2048
        # (multiple of 128 -> unmasked lane stores; sweep 2048-8192).
        tile_b = B if B <= 4096 else 2048
    grid_b = pl.cdiv(B, tile_b)

    resident = lambda shape: pl.BlockSpec(shape, lambda i: (0, 0))
    args = (
        x,                                                       # f32, native (B, d_in)
        w1.astype(mxu_dtype), b1.reshape(h1, 1).astype(jnp.float32),
        w2.astype(mxu_dtype), b2.reshape(h2, 1).astype(jnp.float32),
        wo.reshape(h2, 1).astype(jnp.float32),                   # f32 column for VPU reduce
        bo.reshape(1, 1).astype(jnp.float32),
    )

    out_t = pl.pallas_call(
        mlp_kernel,
        out_shape=jax.ShapeDtypeStruct((1, B), jnp.float32),     # true B: ragged block masked
        grid_spec=pltpu.PrefetchScalarGridSpec(
            num_scalar_prefetch=0,
            grid=(grid_b,),
            in_specs=[
                pl.BlockSpec((tile_b, d_in), lambda i: (i, 0)),  # streaming x tile
                resident((h1, d_in)), resident((h1, 1)),         # fc1 (VMEM-resident)
                resident((h2, h1)),   resident((h2, 1)),         # fc2 (VMEM-resident)
                resident((h2, 1)),    resident((1, 1)),          # out layer (VMEM-resident)
            ],
            out_specs=pl.BlockSpec((1, tile_b), lambda i: (0, i)),
        ),
        compiler_params=pltpu.CompilerParams(
            dimension_semantics=("parallel",)),                  # shards tiles over v7x TCs
    )(*args)

    return out_t.T                                               # (B, 1)


def init_params(key, d_in, widths=(64, 32)):
    """nn.Linear-style uniform(-1/sqrt(fan_in), 1/sqrt(fan_in)) init.
    Weights kept in PyTorch (out_features, in_features) layout; biases (out,)."""
    dims, in_f = [], d_in
    for w in widths:
        dims.append((in_f, w))
        in_f = w
    dims.append((in_f, 1))

    params = []
    for fan_in, fan_out in dims:
        key, kw, kb = jax.random.split(key, 3)
        bound = 1.0 / (fan_in ** 0.5)
        W = jax.random.uniform(kw, (fan_out, fan_in), jnp.float32, -bound, bound)
        b = jax.random.uniform(kb, (fan_out,), jnp.float32, -bound, bound)
        params += [W, b]
    return tuple(params)


def mlp_reference(x, params, *, mxu_dtype=None):
    """Pure-JAX reference of the module forward (dropout = identity, eval).
    mxu_dtype=jnp.bfloat16 mirrors the kernel's hidden-layer matmul-operand
    quantization exactly (final layer stays f32, like the kernel);
    mxu_dtype=None is the plain f32 module semantics."""
    w1, b1, w2, b2, wo, bo = params

    def dense(h, w, b, cast):
        if cast and mxu_dtype is not None:
            h, w = h.astype(mxu_dtype), w.astype(mxu_dtype)
        return jnp.dot(h, w.T, preferred_element_type=jnp.float32) + b

    h = jax.nn.relu(dense(x, w1, b1, True))
    h = jax.nn.relu(dense(h, w2, b2, True))
    return jax.nn.sigmoid(dense(h, wo, bo, False))


if __name__ == "__main__":
    key = jax.random.PRNGKey(0)
    kx, kp = jax.random.split(key)

    D_IN, WIDTHS = 30, (64, 32)
    params = init_params(kp, D_IN, WIDTHS)

    # Small batch: single grid step (tile_b = B), no padding, no wrapper relayout.
    B = 300
    x = jax.random.normal(kx, (B, D_IN), jnp.float32)
    y = jax.block_until_ready(mlp_forward(x, params))
    assert y.shape == (B, 1)

    # Tight check: reference mirroring the kernel's bf16 matmul operands (f32 acc).
    y_bf16 = mlp_reference(x, params, mxu_dtype=jnp.bfloat16)
    assert jnp.allclose(y, y_bf16, atol=1e-4, rtol=1e-4), "mismatch vs bf16-mirrored reference"
    # Loose check: full-f32 module semantics (bf16 operand cast is the only deviation).
    y_f32 = mlp_reference(x, params)
    assert float(jnp.max(jnp.abs(y - y_f32))) < 2e-2, "mismatch vs f32 reference"

    # Larger batch with an explicit tile: exercises the streaming path and Pallas's
    # ragged final block (2500 = 2*1024 + 452) with no padding anywhere.
    B2 = 2500
    x2 = jax.random.normal(jax.random.PRNGKey(1), (B2, D_IN), jnp.float32)
    y2 = jax.block_until_ready(mlp_forward(x2, params, tile_b=1024))
    assert y2.shape == (B2, 1)
    y2_bf16 = mlp_reference(x2, params, mxu_dtype=jnp.bfloat16)
    assert jnp.allclose(y2, y2_bf16, atol=1e-4, rtol=1e-4), "mismatch vs reference (ragged grid)"

    print("KERNEL_OK")
</pallas_src>

<mosaic_0001>
module attributes {stable_mosaic.version = 11 : i64} {
  func.func @mlp_kernel(%arg0: i32, %arg1: memref<300x30xf32, #tpu.memory_space<vmem>>, %arg2: memref<64x30xbf16, #tpu.memory_space<vmem>>, %arg3: memref<64x1xf32, #tpu.memory_space<vmem>>, %arg4: memref<32x64xbf16, #tpu.memory_space<vmem>>, %arg5: memref<32x1xf32, #tpu.memory_space<vmem>>, %arg6: memref<32x1xf32, #tpu.memory_space<vmem>>, %arg7: memref<1x1xf32, #tpu.memory_space<vmem>>, %arg8: memref<1x300xf32, #tpu.memory_space<vmem>>) attributes {dimension_semantics = [#tpu.dimension_semantics<parallel>], iteration_bounds = array<i64: 1>, scalar_prefetch = 0 : i64, scratch_operands = 0 : i64, tpu.core_type = #tpu.core_type<tc>, window_params = [{transform_indices = @transform_0, window_bounds = array<i64: 300, 30>}, {pipeline_mode = #tpu.pipeline_mode<synchronous>, transform_indices = @transform_1, window_bounds = array<i64: 64, 30>}, {pipeline_mode = #tpu.pipeline_mode<synchronous>, transform_indices = @transform_2, window_bounds = array<i64: 64, 1>}, {pipeline_mode = #tpu.pipeline_mode<synchronous>, transform_indices = @transform_3, window_bounds = array<i64: 32, 64>}, {pipeline_mode = #tpu.pipeline_mode<synchronous>, transform_indices = @transform_4, window_bounds = array<i64: 32, 1>}, {pipeline_mode = #tpu.pipeline_mode<synchronous>, transform_indices = @transform_5, window_bounds = array<i64: 32, 1>}, {pipeline_mode = #tpu.pipeline_mode<synchronous>, transform_indices = @transform_6, window_bounds = array<i64: 1, 1>}, {transform_indices = @transform_7, window_bounds = array<i64: 1, 300>}]} {
    %c0 = arith.constant 0 : index
    %c0_0 = arith.constant 0 : index
    %0 = vector.load %arg1[%c0, %c0_0] : memref<300x30xf32, #tpu.memory_space<vmem>>, vector<300x30xf32>
    %1 = arith.truncf %0 : vector<300x30xf32> to vector<300x30xbf16>
    %c0_1 = arith.constant 0 : index
    %c0_2 = arith.constant 0 : index
    %2 = vector.load %arg2[%c0_1, %c0_2] : memref<64x30xbf16, #tpu.memory_space<vmem>>, vector<64x30xbf16>
    %cst = arith.constant dense<0.000000e+00> : vector<64x300xf32>
    %3 = tpu.matmul %2, %1, %cst {dimension_numbers = #tpu.dot_dimension_numbers<[1], [1], [0], [0], [0, 0, 1, 0], [], []>} : vector<64x30xbf16>, vector<300x30xbf16>, vector<64x300xf32> -> vector<64x300xf32>
    %c0_3 = arith.constant 0 : index
    %c0_4 = arith.constant 0 : index
    %4 = vector.load %arg3[%c0_3, %c0_4] : memref<64x1xf32, #tpu.memory_space<vmem>>, vector<64x1xf32>
    %5 = vector.broadcast %4 : vector<64x1xf32> to vector<64x300xf32>
    %6 = arith.addf %3, %5 : vector<64x300xf32>
    %cst_5 = arith.constant 0.000000e+00 : f32
    %7 = vector.broadcast %cst_5 : f32 to vector<64x300xf32>
    %8 = arith.maximumf %6, %7 : vector<64x300xf32>
    %c0_6 = arith.constant 0 : index
    %c0_7 = arith.constant 0 : index
    %9 = vector.load %arg4[%c0_6, %c0_7] : memref<32x64xbf16, #tpu.memory_space<vmem>>, vector<32x64xbf16>
    %10 = arith.truncf %8 : vector<64x300xf32> to vector<64x300xbf16>
    %cst_8 = arith.constant dense<0.000000e+00> : vector<32x300xf32>
    %11 = tpu.matmul %9, %10, %cst_8 {dimension_numbers = #tpu.dot_dimension_numbers<[1], [0], [0], [1], [0, 0, 1, 1], [], []>} : vector<32x64xbf16>, vector<64x300xbf16>, vector<32x300xf32> -> vector<32x300xf32>
    %c0_9 = arith.constant 0 : index
    %c0_10 = arith.constant 0 : index
    %12 = vector.load %arg5[%c0_9, %c0_10] : memref<32x1xf32, #tpu.memory_space<vmem>>, vector<32x1xf32>
    %13 = vector.broadcast %12 : vector<32x1xf32> to vector<32x300xf32>
    %14 = arith.addf %11, %13 : vector<32x300xf32>
    %cst_11 = arith.constant 0.000000e+00 : f32
    %15 = vector.broadcast %cst_11 : f32 to vector<32x300xf32>
    %16 = arith.maximumf %14, %15 : vector<32x300xf32>
    %c0_12 = arith.constant 0 : index
    %c0_13 = arith.constant 0 : index
    %17 = vector.load %arg6[%c0_12, %c0_13] : memref<32x1xf32, #tpu.memory_space<vmem>>, vector<32x1xf32>
    %18 = vector.broadcast %17 : vector<32x1xf32> to vector<32x300xf32>
    %19 = arith.mulf %18, %16 : vector<32x300xf32>
    %cst_14 = arith.constant dense<0.000000e+00> : vector<300xf32>
    %20 = vector.multi_reduction <add>, %19, %cst_14 [0] : vector<32x300xf32> to vector<300xf32>
    %21 = vector.shape_cast %20 : vector<300xf32> to vector<1x300xf32>
    %c0_15 = arith.constant 0 : index
    %c0_16 = arith.constant 0 : index
    %22 = vector.load %arg7[%c0_15, %c0_16] : memref<1x1xf32, #tpu.memory_space<vmem>>, vector<1x1xf32>
    %23 = vector.broadcast %22 : vector<1x1xf32> to vector<1x300xf32>
    %24 = arith.addf %21, %23 : vector<1x300xf32>
    %25 = arith.negf %24 : vector<1x300xf32>
    %26 = math.exp %25 : vector<1x300xf32>
    %cst_17 = arith.constant 1.000000e+00 : f32
    %27 = vector.broadcast %cst_17 : f32 to vector<1x300xf32>
    %28 = arith.addf %27, %26 : vector<1x300xf32>
    %29 = arith.divf %27, %28 : vector<1x300xf32>
    %c0_18 = arith.constant 0 : index
    %c0_19 = arith.constant 0 : index
    %30 = vector.load %arg8[%c0_18, %c0_19] : memref<1x300xf32, #tpu.memory_space<vmem>>, vector<1x300xf32>
    tpu.vector_store %arg8[%c0_18, %c0_19], %29 {strides = array<i32>} : memref<1x300xf32, #tpu.memory_space<vmem>>, vector<1x300xf32>,
    return
  }
  func.func @transform_0(%arg0: i32) -> (i32, i32) {
    %c0_i32 = arith.constant 0 : i32
    %c0_i32_0 = arith.constant 0 : i32
    return %arg0, %c0_i32 : i32, i32
  }
  func.func @transform_1(%arg0: i32) -> (i32, i32) {
    %c0_i32 = arith.constant 0 : i32
    %c0_i32_0 = arith.constant 0 : i32
    %c0_i32_1 = arith.constant 0 : i32
    return %c0_i32, %c0_i32_0 : i32, i32
  }
  func.func @transform_2(%arg0: i32) -> (i32, i32) {
    %c0_i32 = arith.constant 0 : i32
    %c0_i32_0 = arith.constant 0 : i32
    %c0_i32_1 = arith.constant 0 : i32
    return %c0_i32, %c0_i32_0 : i32, i32
  }
  func.func @transform_3(%arg0: i32) -> (i32, i32) {
    %c0_i32 = arith.constant 0 : i32
    %c0_i32_0 = arith.constant 0 : i32
    %c0_i32_1 = arith.constant 0 : i32
    return %c0_i32, %c0_i32_0 : i32, i32
  }
  func.func @transform_4(%arg0: i32) -> (i32, i32) {
    %c0_i32 = arith.constant 0 : i32
    %c0_i32_0 = arith.constant 0 : i32
    %c0_i32_1 = arith.constant 0 : i32
    return %c0_i32, %c0_i32_0 : i32, i32
  }
  func.func @transform_5(%arg0: i32) -> (i32, i32) {
    %c0_i32 = arith.constant 0 : i32
    %c0_i32_0 = arith.constant 0 : i32
    %c0_i32_1 = arith.constant 0 : i32
    return %c0_i32, %c0_i32_0 : i32, i32
  }
  func.func @transform_6(%arg0: i32) -> (i32, i32) {
    %c0_i32 = arith.constant 0 : i32
    %c0_i32_0 = arith.constant 0 : i32
    %c0_i32_1 = arith.constant 0 : i32
    return %c0_i32, %c0_i32_0 : i32, i32
  }
  func.func @transform_7(%arg0: i32) -> (i32, i32) {
    %c0_i32 = arith.constant 0 : i32
    %c0_i32_0 = arith.constant 0 : i32
    return %c0_i32, %arg0 : i32, i32
  }
}

</mosaic_0001>

<bundles_post_ra>
// kernel: tpu_custom_call.1
= control target key start
LH: loop header
LB: loop body
LE: loop exit
PB: predicated region body
PF: predicated region fallthrough
CT: control target
= control target key end

     0   :  { %s1166_s0 = inlined_call_operand.vmem [shape: f32[300,30], index: 0, kind: input, shape index: {}]   ;;  %s1167_s1 = inlined_call_operand.vmem [shape: bf16[64,30], index: 1, kind: input, shape index: {}]   ;;  %s1168_s2 = inlined_call_operand.vmem [shape: f32[64,1], index: 2, kind: input, shape index: {}]   ;;  %s1169_s3 = inlined_call_operand.vmem [shape: bf16[32,64], index: 3, kind: input, shape index: {}]   ;;  %s1170_s4 = inlined_call_operand.vmem [shape: f32[32,1], index: 4, kind: input, shape index: {}]   ;;  %s1171_s5 = inlined_call_operand.vmem [shape: f32[32,1], index: 5, kind: input, shape index: {}]   ;;  %s1172_s6 = inlined_call_operand.<no memory space> [shape: f32[1,1], index: 6, kind: input, shape index: {}]   ;;  %s1173_s7 = inlined_call_operand.hbm [shape: f32[1,300], index: 7, kind: output, shape index: {}]  }
   0x1   :  { %v12_v0 = vstv %s1172_s6 }
   0x2   :  { %13 = vst [vmem:[#allocation2] sm:$0x1] %v12_v0 }
   0x3   :  { %v46_v1 = vld [vmem:[%s1166_s0 + $0x80] sm:$0xff]  ;;  %v47_v2 = vld [vmem:[%s1166_s0 + $0x88] sm:$0xff]  ;;  %vm163_vm0 = vcmask 244736   ;;  %v48_v6 = vld [vmem:[%s1166_s0 + $0x90] sm:$0xff]  ;;  %v853_v8 = vmov 0  }
   0x4   :  { %v30_v3 = vld [vmem:[%s1166_s0] sm:$0xff]  ;;  %v76_v4 = vpack.c.bf16 %v47_v2, %v46_v1  ;;  %v31_v5 = vld [vmem:[%s1166_s0 + $0x8] sm:$0xff]  ;;  %v49_v7 = vld [vmem:[%s1166_s0 + $0x98] sm:$0xff]  ;;  %809 = vset.pattern.permute.xlu0 %v853_v8  ;;  %810 = vset.pattern.permute.xlu1 %v853_v8 }
   0x5   :  { %v68_v9 = vpack.c.bf16 %v31_v5, %v30_v3  ;;  %v77_v10 = vpack.c.bf16 %v49_v7, %v48_v6  ;;  %v32_v11 = vld [vmem:[%s1166_s0 + $0x10] sm:$0xff]  ;;  %v33_v12 = vld [vmem:[%s1166_s0 + $0x18] sm:$0xff]  ;;  %v50_v15 = vld [vmem:[%s1166_s0 + $0xa0] sm:$0xff] }
   0x6   :  { %795 = vmatprep.subr.msk.bf16.mxu0 %vm163_vm0, %v76_v4  ;;  %v69_v14 = vpack.c.bf16 %v33_v12, %v32_v11  ;;  %v51_v16 = vld [vmem:[%s1166_s0 + $0xa8] sm:$0xff]  ;;  %v62_v17 = vld [vmem:[%s1166_s0 + $0x100] sm:$0xff]  ;;  %v64_v20 = vld [vmem:[%s1166_s0 + $0x110] sm:$0xff] }
   0x7   :  { %v177_v13 = vsel %vm163_vm0, %v68_v9, 0  ;;  %v63_v18 = vld [vmem:[%s1166_s0 + $0x108] sm:$0xff]  ;;  %v65_v21 = vld [vmem:[%s1166_s0 + $0x118] sm:$0xff]  ;;  %v78_v23 = vpack.c.bf16 %v51_v16, %v50_v15  ;;  %v34_v26 = vld [vmem:[%s1166_s0 + $0x20] sm:$0xff] }
   0x8   :  { %733 = vmatpush3.bf16.xpose.msra.mxu0 %v177_v13  ;;  %v84_v19 = vpack.c.bf16 %v63_v18, %v62_v17  ;;  %v180_v22 = vsel %vm163_vm0, %v69_v14, 0  ;;  %v85_v25 = vpack.c.bf16 %v65_v21, %v64_v20  ;;  %v35_v27 = vld [vmem:[%s1166_s0 + $0x28] sm:$0xff]  ;;  %v66_v28 = vld [vmem:[%s1166_s0 + $0x120] sm:$0xff]  ;;  %v52_v32 = vld [vmem:[%s1166_s0 + $0xb0] sm:$0xff] }
   0x9   :  { %796 = vmatprep.subr.msk.bf16.mxu0 %vm163_vm0, %v77_v10  ;;  %v67_v29 = vld [vmem:[%s1166_s0 + $0x128] sm:$0xf]  ;;  %v965_v30 = vld [vmem:[%s1167_s1] sm:$0xff]   ;;  %v70_v31 = vpack.c.bf16 %v35_v27, %v34_v26  ;;  %v53_v33 = vld [vmem:[%s1166_s0 + $0xb8] sm:$0xff] }
   0xa   :  { %803 = vmatprep.subr.msk.bf16.mxu1 %vm163_vm0, %v84_v19  ;;  %v225_v24 = vsel %vm163_vm0, %v84_v19, 0  ;;  %748 = vmatprep.mubr.msk.bf16.mxu0 %vm163_vm0, %v965_v30  ;;  %v228_v34 = vsel %vm163_vm0, %v85_v25, 0  ;;  %v86_v35 = vpack.c.bf16 %v67_v29, %v66_v28  ;;  %v95_v36 = vld [vmem:[%s1168_s2] sm:$0xff]  ;;  %v97_v37 = vld [vmem:[%s1168_s2 + $0x10] sm:$0xff]  ;;  %v79_v39 = vpack.c.bf16 %v53_v33, %v52_v32  ;;  %v96_v40 = vld [vmem:[%s1168_s2 + $0x8] sm:$0xff] }
   0xb   :  { %770 = vmatpush3.bf16.xpose.msra.mxu1 %v225_v24  ;;  %775 = vmatprep.mubr.msk.bf16.mxu1 %vm163_vm0, %v965_v30  ;;  %v183_v38 = vsel %vm163_vm0, %v70_v31, 0  ;;  %v36_v41 = vld [vmem:[%s1166_s0 + $0x30] sm:$0xff]  ;;  %v37_v42 = vld [vmem:[%s1166_s0 + $0x38] sm:$0xff]  ;;  %v54_v44 = vld [vmem:[%s1166_s0 + $0xc0] sm:$0xff] }
   0xc   :  { %804 = vmatprep.subr.msk.bf16.mxu1 %vm163_vm0, %v85_v25  ;;  %105 = vperm.xlu0 %809, %v95_v36   ;;  %v98_v43 = vld [vmem:[%s1168_s2 + $0x18] sm:$0xff]  ;;  %v55_v45 = vld [vmem:[%s1166_s0 + $0xc8] sm:$0xff]  ;;  %v99_v46 = vld [vmem:[%s1168_s2 + $0x20] sm:$0xff]  ;;  %v71_v47 = vpack.c.bf16 %v37_v42, %v36_v41 }
   0xd   :  { %115 = vperm.xlu1 %810, %v97_v37   ;;  %v100_v48 = vld [vmem:[%s1168_s2 + $0x28] sm:$0xff] }
  0x10   :  { %735 = vmatpush3.bf16.xpose.msra.mxu0 %v180_v22  ;;  %110 = vperm.xlu0 %809, %v96_v40  }
  0x11   :  { %797 = vmatprep.subr.msk.bf16.mxu0 %vm163_vm0, %v78_v23  ;;  %120 = vperm.xlu1 %810, %v98_v43  }
  0x13   :  { %772 = vmatpush3.bf16.xpose.msra.mxu1 %v228_v34 }
  0x14   :  { %805 = vmatprep.subr.msk.bf16.mxu1 %vm163_vm0, %v86_v35 }
  0x18   :  { %737 = vmatpush3.bf16.xpose.msra.mxu0 %v183_v38 }
  0x19   :  { %798 = vmatprep.subr.msk.bf16.mxu0 %vm163_vm0, %v79_v39 }
  0x1a   :  { %14 = vsyncpa [#allocation4], 0  ;;  %v231_v49 = vsel %vm163_vm0, %v86_v35, 0  ;;  %125 = vperm.xlu0 %809, %v99_v46   ;;  %v186_v50 = vsel %vm163_vm0, %v71_v47, 0  ;;  %v80_v51 = vpack.c.bf16 %v55_v45, %v54_v44  ;;  %v101_v52 = vld [vmem:[%s1168_s2 + $0x30] sm:$0xff]  ;;  %130 = vperm.xlu1 %810, %v100_v48   ;;  %v38_v53 = vld [vmem:[%s1166_s0 + $0x40] sm:$0xff] }
  0x1b   :  { %v39_v54 = vld [vmem:[%s1166_s0 + $0x48] sm:$0xff]  ;;  %774 = vmatpush3.bf16.xpose.msra.mxu1 %v231_v49  ;;  %v102_v55 = vld [vmem:[%s1168_s2 + $0x38] sm:$0xff]  ;;  %v56_v57 = vld [vmem:[%s1166_s0 + $0xd0] sm:$0xff]  ;;  %vm445_vm1 = vcmask 523264   ;;  %vm620_vm2 = vcmask 359424  }
  0x1c   :  { %v72_v56 = vpack.c.bf16 %v39_v54, %v38_v53  ;;  %v812_v58 = vld [vmem:[%s1167_s1 + $0x8] sm:$0xff]   ;;  %v411_v59 = vld [vmem:[%s1170_s4] sm:$0xff]  ;;  %v57_v60 = vld [vmem:[%s1166_s0 + $0xd8] sm:$0xff] }
  0x1d   :  { %v813_v61 = vld [vmem:[%s1167_s1 + $0x10] sm:$0xff]   ;;  %v412_v62 = vld [vmem:[%s1170_s4 + $0x8] sm:$0xff]  ;;  %v81_v0 = vpack.c.bf16 %v57_v60, %v56_v57  ;;  %v41_v3 = vld [vmem:[%s1166_s0 + $0x58] sm:$0xff] }
  0x1e   :  { %135 = vperm.xlu0 %809, %v101_v52   ;;  %140 = vperm.xlu1 %810, %v102_v55   ;;  %v189_v63 = vsel %vm163_vm0, %v72_v56, 0  ;;  %v413_v1 = vld [vmem:[%s1170_s4 + $0x10] sm:$0xff]  ;;  %v414_v4 = vld [vmem:[%s1170_s4 + $0x18] sm:$0xff]  ;;  %v566_v7 = vld [vmem:[%s1171_s5] sm:$0xff] }
  0x1f   :  { %v40_v2 = vld [vmem:[%s1166_s0 + $0x50] sm:$0xff]  ;;  %v814_v6 = vld [vmem:[%s1167_s1 + $0x18] sm:$0xff]   ;;  %v58_v9 = vld [vmem:[%s1166_s0 + $0xe0] sm:$0xff] }
  0x20   :  { %739 = vmatpush3.bf16.xpose.msra.mxu0 %v186_v50  ;;  %v73_v5 = vpack.c.bf16 %v41_v3, %v40_v2  ;;  %v59_v10 = vld [vmem:[%s1166_s0 + $0xe8] sm:$0xff]  ;;  %v568_v14 = vld [vmem:[%s1171_s5 + $0x10] sm:$0xff]  ;;  %v42_v15 = vld [vmem:[%s1166_s0 + $0x60] sm:$0xff] }
  0x21   :  { %799 = vmatprep.subr.msk.bf16.mxu0 %vm163_vm0, %v80_v51  ;;  %v567_v11 = vld [vmem:[%s1171_s5 + $0x8] sm:$0xff]  ;;  %v82_v13 = vpack.c.bf16 %v59_v10, %v58_v9  ;;  %v569_v17 = vld [vmem:[%s1171_s5 + $0x18] sm:$0xff]  ;;  %v634_v19 = vld [vmem:[#allocation2] sm:$0x1] }
  0x22   :  { %417 = vperm.xlu0 %809, %v411_v59   ;;  %776 = vmatmul.mubr.msk.bf16.vlgmr.msra.gmra.mrb[0].mxu1 %vm163_vm0, %v812_v58  ;;  %v192_v12 = vsel %vm163_vm0, %v73_v5, 0  ;;  %v43_v16 = vld [vmem:[%s1166_s0 + $0x68] sm:$0xff]  ;;  %v60_v20 = vld [vmem:[%s1166_s0 + $0xf0] sm:$0xff]  ;;  %v61_v21 = vld [vmem:[%s1166_s0 + $0xf8] sm:$0xff] }
  0x23   :  { %422 = vperm.xlu1 %810, %v412_v62   ;;  %779 = vmatprep.mubr.msk.bf16.mxu1 %vm163_vm0, %v813_v61  ;;  %v74_v18 = vpack.c.bf16 %v43_v16, %v42_v15  ;;  %v83_v23 = vpack.c.bf16 %v61_v21, %v60_v20  ;;  %v44_v24 = vld [vmem:[%s1166_s0 + $0x70] sm:$0xff]  ;;  %v45_v25 = vld [vmem:[%s1166_s0 + $0x78] sm:$0xff] }
  0x24   :  { %v75_v26 = vpack.c.bf16 %v45_v25, %v44_v24 }
  0x25   :  { %v195_v22 = vsel %vm163_vm0, %v74_v18, 0 }
  0x26   :  { %427 = vperm.xlu0 %809, %v413_v1   ;;  %v198_v27 = vsel %vm163_vm0, %v75_v26, 0 }
  0x27   :  { %432 = vperm.xlu1 %810, %v414_v4  }
  0x28   :  { %741 = vmatpush3.bf16.xpose.msra.mxu0 %v189_v63 }
  0x29   :  { %800 = vmatprep.subr.msk.bf16.mxu0 %vm163_vm0, %v81_v0 }
  0x2a   :  { %572 = vperm.xlu0 %809, %v566_v7   ;;  %780 = vmatmul.mubr.msk.bf16.gmra.mrb[4].mxu1 %vm163_vm0, %v814_v6 }
  0x2b   :  { %577 = vperm.xlu1 %810, %v567_v11   ;;  %484 = vmatprep.mubr.bf16.mxu1 %v853_v8 }
  0x2e   :  { %582 = vperm.xlu0 %809, %v568_v14  }
  0x2f   :  { %587 = vperm.xlu1 %810, %v569_v17  }
  0x30   :  { %743 = vmatpush3.bf16.xpose.msra.mxu0 %v192_v12 }
  0x31   :  { %801 = vmatprep.subr.msk.bf16.mxu0 %vm163_vm0, %v82_v13 }
  0x32   :  { %637 = vperm.xlu0 %809, %v634_v19  }
  0x38   :  { %745 = vmatpush3.bf16.xpose.msra.mxu0 %v195_v22 }
  0x39   :  { %802 = vmatprep.subr.msk.bf16.mxu0 %vm163_vm0, %v83_v23 }
  0x40   :  { %747 = vmatpush3.bf16.xpose.msra.mxu0 %v198_v27 }
  0x47   :  { %749 = vmatmul.mubr.msk.bf16.vlgmr.msra.gmra.mrb[0].mxu0 %vm163_vm0, %v965_v30 }
  0x48   :  { %750 = vmatprep.mubr.msk.bf16.mxu0 %vm163_vm0, %v812_v58 }
  0x4f   :  { %751 = vmatmul.mubr.msk.bf16.gmra.mrb[4].mxu0 %vm163_vm0, %v812_v58 }
  0x50   :  { %752 = vmatprep.mubr.msk.bf16.mxu0 %vm163_vm0, %v813_v61 }
  0x57   :  { %753 = vmatmul.mubr.msk.bf16.gmra.mrb[8].mxu0 %vm163_vm0, %v813_v61 }
  0x58   :  { %754 = vmatprep.mubr.msk.bf16.mxu0 %vm163_vm0, %v814_v6 }
  0x5f   :  { %755 = vmatmul.mubr.msk.bf16.gmra.mrb[12].mxu0 %vm163_vm0, %v814_v6 }
  0x8b   :  { %v106_v28 = vpop.permute.xlu0 %105 }
  0x8c   :  { %v116_v29 = vpop.permute.xlu1 %115 }
  0x8f   :  { %v111_v31 = vpop.permute.xlu0 %110 }
  0x90   :  { %v121_v32 = vpop.permute.xlu1 %120 }
  0x99   :  { %v126_v30 = vpop.permute.xlu0 %125  ;;  %v131_v41 = vpop.permute.xlu1 %130 }
  0x9d   :  { %v1117_v47 = vpop.permute.xlu0 %135  ;;  %v1122_v52 = vpop.permute.xlu1 %140 }
  0xf5   :  { %v777_v33 = vpop.f32.mrb[0].mxu1 }
  0xf6   :  { %v349_v34 = vadd.f32 %v777_v33, %v116_v29  ;;  %v340_v35 = vpop.f32.mrb[1].mxu1 }
  0xf7   :  { %v341_v36 = vadd.f32 %v340_v35, %v106_v28  ;;  %v778_v37 = vpop.f32.mrb[2].mxu1 }
  0xf8   :  { %v379_v38 = vmax.f32 %v349_v34, 0.0  ;;  %v352_v39 = vadd.f32 %v778_v37, %v121_v32  ;;  %v343_v40 = vpop.f32.mrb[3].mxu1 }
  0xf9   :  { %v373_v42 = vmax.f32 %v341_v36, 0.0  ;;  %v344_v43 = vadd.f32 %v343_v40, %v111_v31 }
  0xfa   :  { %v382_v44 = vmax.f32 %v352_v39, 0.0 }
  0xfb   :  { %v376_v45 = vmax.f32 %v344_v43, 0.0 }
  0xfc   :  { %v1115_v46 = vpack.c.bf16 %v382_v44, %v379_v38 }
  0xfd   :  { %v1119_v48 = vpack.c.bf16 %v376_v45, %v373_v42  ;;  %v781_v49 = vpop.f32.mrb[4].mxu1 }
  0xfe   :  { %v365_v50 = vadd.f32 %v781_v49, %v1117_v47  ;;  %v356_v51 = vpop.f32.mrb[5].mxu1 }
  0xff   :  { %v357_v53 = vadd.f32 %v356_v51, %v126_v30  ;;  %v782_v54 = vpop.f32.mrb[6].mxu1 }
 0x100   :  { %v391_v55 = vmax.f32 %v365_v50, 0.0  ;;  %v368_v56 = vadd.f32 %v782_v54, %v1122_v52  ;;  %v359_v57 = vpop.f32.mrb[7].mxu1 }
 0x101   :  { %v385_v58 = vmax.f32 %v357_v53, 0.0  ;;  %v360_v59 = vadd.f32 %v359_v57, %v131_v41 }
 0x102   :  { %v394_v60 = vmax.f32 %v368_v56, 0.0 }
 0x103   :  { %v388_v61 = vmax.f32 %v360_v59, 0.0 }
 0x104   :  { %v1125_v62 = vpack.c.bf16 %v394_v60, %v391_v55 }
 0x105   :  { %v1127_v63 = vpack.c.bf16 %v388_v61, %v385_v58  ;;  %v815_v61 = vld [vmem:[%s1169_s3] sm:$0xff]  }
 0x11a   :  { %v267_v0 = vpop.f32.mrb[0].mxu0 }
 0x11b   :  { %v268_v1 = vadd.f32 %v267_v0, %v106_v28  ;;  %v269_v2 = vpop.f32.mrb[1].mxu0 }
 0x11c   :  { %v270_v3 = vadd.f32 %v269_v2, %v106_v28  ;;  %v271_v4 = vpop.f32.mrb[2].mxu0 }
 0x11d   :  { %v272_v5 = vadd.f32 %v271_v4, %v111_v31  ;;  %v273_v6 = vpop.f32.mrb[3].mxu0  ;;  %v371_v9 = vmax.f32 %v268_v1, 0.0 }
 0x11e   :  { %v274_v7 = vadd.f32 %v273_v6, %v111_v31  ;;  %v372_v11 = vmax.f32 %v270_v3, 0.0 }
 0x11f   :  { %v374_v10 = vmax.f32 %v272_v5, 0.0 }
 0x120   :  { %v375_v12 = vmax.f32 %v274_v7, 0.0 }
 0x121   :  { %v399_v13 = vpack.c.bf16 %v374_v10, %v371_v9 }
 0x122   :  { %v400_v14 = vpack.c.bf16 %v375_v12, %v372_v11  ;;  %v277_v15 = vpop.f32.mrb[4].mxu0 }
 0x123   :  { %v278_v16 = vadd.f32 %v277_v15, %v116_v29  ;;  %v279_v17 = vpop.f32.mrb[5].mxu0 }
 0x124   :  { %v280_v18 = vadd.f32 %v279_v17, %v116_v29  ;;  %v281_v19 = vpop.f32.mrb[6].mxu0  ;;  %452 = vmatprep.subr.bf16.mxu1 %v400_v14 }
 0x125   :  { %v282_v20 = vadd.f32 %v281_v19, %v121_v32  ;;  %v283_v21 = vpop.f32.mrb[7].mxu0  ;;  %453 = vmatpush1.bf16.msra.mxu1 %v399_v13  ;;  %v377_v23 = vmax.f32 %v278_v16, 0.0 }
 0x126   :  { %v284_v22 = vadd.f32 %v283_v21, %v121_v32  ;;  %v378_v25 = vmax.f32 %v280_v18, 0.0 }
 0x127   :  { %v380_v24 = vmax.f32 %v282_v20, 0.0 }
 0x128   :  { %v381_v26 = vmax.f32 %v284_v22, 0.0 }
 0x129   :  { %v402_v27 = vpack.c.bf16 %v380_v24, %v377_v23 }
 0x12a   :  { %v403_v28 = vpack.c.bf16 %v381_v26, %v378_v25  ;;  %v287_v31 = vpop.f32.mrb[8].mxu0 }
 0x12b   :  { %v288_v33 = vadd.f32 %v287_v31, %v126_v30  ;;  %v289_v34 = vpop.f32.mrb[9].mxu0 }
 0x12c   :  { %v290_v35 = vadd.f32 %v289_v34, %v126_v30  ;;  %v291_v36 = vpop.f32.mrb[10].mxu0  ;;  %454 = vmatprep.subr.bf16.mxu1 %v403_v28 }
 0x12d   :  { %v292_v37 = vadd.f32 %v291_v36, %v131_v41  ;;  %v293_v29 = vpop.f32.mrb[11].mxu0  ;;  %455 = vmatpush1.bf16.msra.mxu1 %v402_v27  ;;  %v383_v39 = vmax.f32 %v288_v33, 0.0 }
 0x12e   :  { %v294_v38 = vadd.f32 %v293_v29, %v131_v41  ;;  %v384_v42 = vmax.f32 %v290_v35, 0.0 }
 0x12f   :  { %v386_v40 = vmax.f32 %v292_v37, 0.0 }
 0x130   :  { %v387_v32 = vmax.f32 %v294_v38, 0.0 }
 0x131   :  { %v405_v43 = vpack.c.bf16 %v386_v40, %v383_v39 }
 0x132   :  { %v406_v44 = vpack.c.bf16 %v387_v32, %v384_v42  ;;  %v297_v45 = vpop.f32.mrb[12].mxu0  ;;  %v640_v32 = vlaneseq }
 0x133   :  { %v298_v49 = vadd.f32 %v297_v45, %v1117_v47  ;;  %v299_v50 = vpop.f32.mrb[13].mxu0 }
 0x134   :  { %v300_v51 = vadd.f32 %v299_v50, %v1117_v47  ;;  %v301_v53 = vpop.f32.mrb[14].mxu0  ;;  %456 = vmatprep.subr.bf16.mxu1 %v406_v44  ;;  %v816_v47 = vld [vmem:[%s1169_s3 + $0x8] sm:$0xff]   ;;  %s855_s3 = smov [#allocation3]   ;;  %vm694_vm3 = vcmp.lt.s32.totalorder %v640_v32, 300 }
 0x135   :  { %v302_v30 = vadd.f32 %v301_v53, %v1122_v52  ;;  %v303_v54 = vpop.f32.mrb[15].mxu0  ;;  %457 = vmatpush1.bf16.msra.mxu1 %v405_v43  ;;  %v389_v55 = vmax.f32 %v298_v49, 0.0  ;;  %s703_s20 = sshll.u32 %s855_s3, 4  ;;  %s704_s20 = int_to_ptr.vmem [resolvable:$true] %s703_s20 }
 0x136   :  { %v304_v41 = vadd.f32 %v303_v54, %v1122_v52  ;;  %v390_v57 = vmax.f32 %v300_v51, 0.0  ;;  %s829_s21 = scalar_lea.vmem %s704_s20, 48  ;;  %s833_s22 = scalar_lea.vmem %s704_s20, 64 }
 0x137   :  { %v392_v56 = vmax.f32 %v302_v30, 0.0  ;;  %p830_p0 = scmp.ne.s32.totalorder %s704_s20, %s829_s21  ;;  %p834_p1 = scmp.lt.s32.totalorder %s704_s20, %s704_s20 }
 0x138   :  { %v393_v58 = vmax.f32 %v304_v41, 0.0  ;;  %p835_p2 = scmp.lt.s32.totalorder %s833_s22, %s829_s21 }
 0x139   :  { %v408_v59 = vpack.c.bf16 %v392_v56, %v389_v55 }
 0x13a   :  { %v409_v60 = vpack.c.bf16 %v393_v58, %v390_v57  ;;  %v641_v58 = vshrl.u32 %v640_v32, 7  ;;  %p836_p3 = por %p835_p2, %p834_p1 }
 0x13c   :  { %458 = vmatprep.subr.bf16.mxu1 %v409_v60  ;;  %p837_p4 = pnand %p836_p3, %p830_p0 }
 0x13d   :  { %459 = vmatpush1.bf16.msra.mxu1 %v408_v59 }
 0x13e   :  { %783 = vmatprep.subr.bf16.mxu1 %v1119_v48 }
 0x140   :  { %725 = vmatmul.mubr.msk.bf16.vlgmr.msra.gmra.mrb[8].mxu1 %vm445_vm1, %v815_v61 }
 0x141   :  { %784 = vmatpush3.bf16.msra.mxu1 %v1119_v48  ;;  %494 = vmatprep.mubr.bf16.mxu1 %v853_v8  ;;  %v418_v8 = vpop.permute.xlu0 %417  ;;  %v423_v48 = vpop.permute.xlu1 %422 }
 0x142   :  { %785 = vmatprep.subr.bf16.mxu1 %v1115_v46 }
 0x145   :  { %786 = vmatpush3.bf16.msra.mxu1 %v1115_v46  ;;  %v428_v52 = vpop.permute.xlu0 %427  ;;  %v433_v0 = vpop.permute.xlu1 %432 }
 0x146   :  { %787 = vmatprep.subr.bf16.mxu1 %v1127_v63 }
 0x148   :  { %726 = vmatmul.mubr.msk.bf16.gmra.mrb[12].mxu1 %vm445_vm1, %v816_v47 }
 0x149   :  { %788 = vmatpush3.bf16.msra.mxu1 %v1127_v63  ;;  %791 = vmatprep.mubr.msk.bf16.mxu1 %vm445_vm1, %v815_v61  ;;  %v573_v11 = vpop.permute.xlu0 %572  ;;  %v578_v12 = vpop.permute.xlu1 %577 }
 0x14a   :  { %789 = vmatprep.subr.bf16.mxu1 %v1125_v62 }
 0x14d   :  { %790 = vmatpush3.bf16.msra.mxu1 %v1125_v62  ;;  %v583_v27 = vpop.permute.xlu0 %582  ;;  %v588_v35 = vpop.permute.xlu1 %587 }
 0x150   :  { %792 = vmatmul.mubr.msk.bf16.vlgmr.msra.gmra.mrb[16].mxu1 %vm445_vm1, %v816_v47 }
 0x213   :  { %v486_v1 = vpop.f32.mrb[8].mxu1 }
 0x214   :  { %v487_v2 = vadd.f32 %v486_v1, %v418_v8  ;;  %v488_v3 = vpop.f32.mrb[9].mxu1 }
 0x215   :  { %v489_v4 = vadd.f32 %v488_v3, %v418_v8  ;;  %v490_v46 = vpop.f32.mrb[10].mxu1 }
 0x216   :  { %v554_v5 = vmax.f32 %v487_v2, 0.0  ;;  %v491_v6 = vadd.f32 %v490_v46, %v423_v48  ;;  %v492_v7 = vpop.f32.mrb[11].mxu1 }
 0x217   :  { %v555_v9 = vmax.f32 %v489_v4, 0.0  ;;  %v493_v63 = vadd.f32 %v492_v7, %v423_v48  ;;  %v642_v4 = vsub.s32 0, %v641_v58 }
 0x218   :  { %v557_v10 = vmax.f32 %v491_v6, 0.0  ;;  %v590_v62 = vmul.f32 %v573_v11, %v554_v5 }
 0x219   :  { %v558_v13 = vmax.f32 %v493_v63, 0.0  ;;  %v591_v15 = vmul.f32 %v573_v11, %v555_v9 }
 0x21a   :  { %v593_v14 = vmul.f32 %v578_v12, %v557_v10 }
 0x21b   :  { %v594_v16 = vmul.f32 %v578_v12, %v558_v13  ;;  %v496_v17 = vpop.f32.mrb[12].mxu1 }
 0x21c   :  { %v602_v18 = vadd.f32 %v593_v14, %v590_v62  ;;  %v497_v19 = vadd.f32 %v496_v17, %v428_v52  ;;  %v498_v20 = vpop.f32.mrb[13].mxu1 }
 0x21d   :  { %v611_v21 = vadd.f32 %v594_v16, %v591_v15  ;;  %v499_v22 = vadd.f32 %v498_v20, %v428_v52  ;;  %v500_v23 = vpop.f32.mrb[14].mxu1 }
 0x21e   :  { %v560_v24 = vmax.f32 %v497_v19, 0.0  ;;  %v501_v25 = vadd.f32 %v500_v23, %v433_v0  ;;  %v502_v26 = vpop.f32.mrb[15].mxu1 }
 0x21f   :  { %v561_v28 = vmax.f32 %v499_v22, 0.0  ;;  %v503_v31 = vadd.f32 %v502_v26, %v433_v0 }
 0x220   :  { %v596_v33 = vmul.f32 %v583_v27, %v560_v24  ;;  %v563_v34 = vmax.f32 %v501_v25, 0.0 }
 0x221   :  { %v597_v36 = vmul.f32 %v583_v27, %v561_v28  ;;  %v564_v37 = vmax.f32 %v503_v31, 0.0 }
 0x222   :  { %v603_v29 = vadd.f32 %v602_v18, %v596_v33  ;;  %v599_v38 = vmul.f32 %v588_v35, %v563_v34 }
 0x223   :  { %v612_v39 = vadd.f32 %v611_v21, %v597_v36  ;;  %v600_v40 = vmul.f32 %v588_v35, %v564_v37  ;;  %v793_v42 = vpop.f32.mrb[16].mxu1 }
 0x224   :  { %v604_v43 = vadd.f32 %v603_v29, %v599_v38  ;;  %v548_v44 = vadd.f32 %v793_v42, %v428_v52  ;;  %v539_v45 = vpop.f32.mrb[17].mxu1 }
 0x225   :  { %v613_v49 = vadd.f32 %v612_v39, %v600_v40  ;;  %v540_v50 = vadd.f32 %v539_v45, %v418_v8  ;;  %v794_v51 = vpop.f32.mrb[18].mxu1  ;;  %v854_v40 = vmov 1966171168  }
 0x226   :  { %v605_v53 = vrot.slane %v604_v43, 4  ;;  %v551_v30 = vadd.f32 %v794_v51, %v433_v0  ;;  %v542_v54 = vpop.f32.mrb[19].mxu1  ;;  %v562_v55 = vmax.f32 %v548_v44, 0.0  ;;  %v638_v0 = vpop.permute.xlu0 %637  ;;  %v670_v42 = vunpack.c.l.s4 %v854_v40 }
 0x227   :  { %v614_v41 = vrot.slane %v613_v49, 4  ;;  %v556_v56 = vmax.f32 %v540_v50, 0.0  ;;  %v543_v57 = vadd.f32 %v542_v54, %v423_v48  ;;  %v643_v13 = vrot.slane %v638_v0, %v642_v4 }
 0x228   :  { %v606_v59 = vadd.f32 %v605_v53, %v604_v43  ;;  %v565_v47 = vmax.f32 %v551_v30, 0.0  ;;  %v598_v3 = vmul.f32 %v583_v27, %v562_v55  ;;  %v671_v43 = vunpack.c.0.s8 %v670_v42 }
 0x229   :  { %v615_v60 = vadd.f32 %v614_v41, %v613_v49  ;;  %v592_v61 = vmul.f32 %v573_v11, %v556_v56  ;;  %v559_v1 = vmax.f32 %v543_v57, 0.0 }
 0x22a   :  { %v607_v2 = vrot.slane %v606_v59, 2  ;;  %v601_v7 = vmul.f32 %v588_v35, %v565_v47  ;;  %v624_v11 = vsel %vm620_vm2, %v598_v3, 0.0  ;;  %v674_v44 = vsub.s32 %v671_v43, %v641_v58 }
 0x22b   :  { %v616_v52 = vrot.slane %v615_v60, 2  ;;  %v595_v8 = vmul.f32 %v578_v12, %v559_v1  ;;  %v621_v6 = vsel %vm620_vm2, %v592_v61, 0.0 }
 0x22c   :  { %v608_v46 = vadd.f32 %v607_v2, %v606_v59  ;;  %v626_v12 = vsel %vm620_vm2, %v601_v7, 0.0 }
 0x22d   :  { %v617_v5 = vadd.f32 %v616_v52, %v615_v60  ;;  %v622_v48 = vsel %vm620_vm2, %v595_v8, 0.0 }
 0x22e   :  { %v609_v9 = vrot.slane %v608_v46, 1  ;;  %v623_v63 = vadd.f32 %v622_v48, %v621_v6 }
 0x22f   :  { %v618_v10 = vrot.slane %v617_v5, 1 }
 0x230   :  { %v610_v62 = vadd.f32 %v609_v9, %v608_v46  ;;  %v625_v14 = vadd.f32 %v624_v11, %v623_v63 }
 0x231   :  { %v619_v15 = vadd.f32 %v618_v10, %v617_v5 }
 0x232   :  { %v644_v16 = vadd.f32 %v643_v13, %v610_v62  ;;  %v627_v17 = vadd.f32 %v626_v12, %v625_v14 }
 0x233   :  { %v645_v18 = vadd.f32 %v643_v13, %v619_v15 }
 0x234   :  { %v729_v19 = vmul.f32 -1.442695, %v644_v16  ;;  %v628_v20 = vrot.slane %v627_v17, 4 }
 0x235   :  { %v730_v21 = vmul.f32 -1.442695, %v645_v18 }
 0x236   :  { %817 = vpow2.f32 %v729_v19  ;;  %v629_v22 = vadd.f32 %v628_v20, %v627_v17 }
 0x237   :  { %819 = vpow2.f32 %v730_v21 }
 0x238   :  { %v630_v23 = vrot.slane %v629_v22, 2 }
 0x23a   :  { %v631_v24 = vadd.f32 %v630_v23, %v629_v22 }
 0x23c   :  { %v632_v25 = vrot.slane %v631_v24, 1 }
 0x23e   :  { %v633_v26 = vadd.f32 %v632_v25, %v631_v24 }
 0x240   :  { %v818_v27 = vpop.eup %817  ;;  %v646_v28 = vadd.f32 %v643_v13, %v633_v26 }
 0x241   :  { %v820_v31 = vpop.eup %819  ;;  %v656_v33 = vadd.f32 1.0, %v818_v27 }
 0x242   :  { %v657_v34 = vadd.f32 1.0, %v820_v31  ;;  %v731_v35 = vmul.f32 -1.442695, %v646_v28 }
 0x243   :  { %821 = vrcp.f32 %v656_v33 }
 0x244   :  { %823 = vrcp.f32 %v657_v34 }
 0x245   :  { %825 = vpow2.f32 %v731_v35 }
 0x24d   :  { %v822_v36 = vpop.eup %821 }
 0x24e   :  { %v824_v37 = vpop.eup %823 }
 0x24f   :  { %v826_v29 = vpop.eup %825  ;;  %v668_v38 = vcombine.low %v822_v36, %v824_v37 }
 0x250   :  { %v658_v39 = vadd.f32 1.0, %v826_v29 }
 0x251   :  { %v675_v49 = vrot.slane %v668_v38, %v674_v44 }
 0x252   :  { %827 = vrcp.f32 %v658_v39 }
 0x25c   :  { %v828_v45 = vpop.eup %827 }
 0x25d   :  { %v682_v50 = vrot.slane %v828_v45, %v674_v44 }
 0x25f   :  { %v683_v51 = vcombine.low %v675_v49, %v682_v50 }
 0x261   :  { %v690_v53 = vrot.slane %v683_v51, %v674_v44 }
 0x263   :  { %696 = vst.msk [vmem:[#allocation3] sm:$0x7] %vm694_vm3, %v690_v53 }
 0x264   :  { %840 = shalt.err (!%p837_p4)
}
 0x265   :  { %s841_s25 = scalar_lea.hbm %s1173_s7, 48 }
 0x266   :  { %p842_p5 = scmp.ne.s32.totalorder %s1173_s7, %s841_s25  ;;  %p845_p6 = scmp.lt.u32.totalorder %s841_s25, %s1173_s7 }
 0x268   :  { %p847_p7 = pnand %p845_p6, %p842_p5 }
 0x26a   :  { %850 = shalt.err (!%p847_p7)
}
 0x26b   :  { %706 = dma.vmem_to_hbm [thread:$0]  %s704_s20, 48, %s1173_s7, [#allocation4]  }
 0x26c   :  { %851 = dma.done.wait [#allocation4], 48  }
 0x26d   :  { %852 = vsyncadd [#allocation4], 4294967248 }
 0x26e   :  { %710 = vsyncpa [#allocation4], 1 }

</bundles_post_ra>
